<compile_context>
chip_gen: v7x
topology: tpu7x:2x2x1
jax: 0.10.0
libtpu: 0.0.40
codegen_flags: <defaults>
</compile_context>

<pallas_src>
import functools

import jax
import jax.numpy as jnp
from jax.experimental import pallas as pl
from jax.experimental.pallas import tpu as pltpu


_ROW_ALIGN = 32  # int8 mask packs 4 rows/sublane -> keep row tiles 32-aligned


def _round_up(x, m):
    return ((x + m - 1) // m) * m


def _conf_loss_kernel(f_ref, m_ref, out_ref, *, rows_total, tile_rows, eps):
    """One (tile_rows, W) tile -> one partial loss sum in its own (8,128) block."""
    f = f_ref[...].astype(jnp.float32)               # native-dtype load, f32 math
    match = m_ref[...] != 0                          # int8 mask -> bool (VPU)
    val = jnp.where(match, f + eps, (1.0 - f) + eps)

    if rows_total % tile_rows != 0:
        # Tail mask (only emitted when the grid overruns the row axis).  A
        # (TR, 1) iota broadcasts inside the where; invalid rows get val=1 so
        # -log(val)=0 and any NaN/Inf garbage read from the OOB region is
        # scrubbed before the log.
        row = (pl.program_id(0) * tile_rows
               + jax.lax.broadcasted_iota(jnp.int32, (tile_rows, 1), 0))
        val = jnp.where(row < rows_total, val, 1.0)

    partial = jnp.sum(-jnp.log(val))                 # EUP log + reduce

    # Per-tile partial lands in element (0,0) of this tile's own (8,128)
    # aligned output block; the wrapper sums the blocks.  No cross-iteration
    # accumulator -> the grid axis is truly parallel (megacore friendly).
    r = jax.lax.broadcasted_iota(jnp.int32, out_ref.shape, 0)
    c = jax.lax.broadcasted_iota(jnp.int32, out_ref.shape, 1)
    out_ref[...] = jnp.where((r == 0) & (c == 0), partial, 0.0)


def _masked_log_loss_sum(f2d, match2d, *, eps=1e-7, tile_rows=None):
    """f2d: (ROWS, W) float (any dtype), match2d: (ROWS, W) int8 -> scalar sum."""
    rows, wdim = f2d.shape
    f_itemsize = jnp.dtype(f2d.dtype).itemsize

    if tile_rows is None:
        # ~2 MiB per f-block (+ <=0.5 MiB int8 mask) x 2 pipeline buffers ~= 5-6
        # MiB of VMEM: comfortably inside v5e's 16 MiB scoped default and tiny
        # vs v7x's 64 MiB physical.  2 MiB tiles already sit near the HBM
        # roofline, so bigger blocks are not needed on any generation.
        cap = max(_ROW_ALIGN,
                  ((2 << 20) // (f_itemsize * wdim)) // _ROW_ALIGN * _ROW_ALIGN)
        # Prefer >= 2 grid steps so the "parallel" axis shards across v7x's two
        # TensorCores even on small/medium images.
        want = _round_up(max(1, pl.cdiv(rows, 2)), _ROW_ALIGN)
        tile_rows = min(cap, want)
        if tile_rows >= rows:
            tile_rows = rows          # single full-extent block (always legal)

    num_tiles = pl.cdiv(rows, tile_rows)

    # Explicit VMEM budget: double-buffered f + mask inputs plus the (8,128)
    # output block, with generous headroom; >= 16 MiB, <= 64 MiB so it is valid
    # on every generation (v5e/v6e 128 MiB, v7x 64 MiB physical).
    f_block = tile_rows * wdim * f_itemsize
    m_block = tile_rows * wdim
    o_block = 8 * 128 * 4
    vmem_limit = min(max(2 * (f_block + m_block + o_block) + (4 << 20), 16 << 20),
                     64 << 20)

    kernel = functools.partial(_conf_loss_kernel, rows_total=rows,
                               tile_rows=tile_rows, eps=eps)

    partials = pl.pallas_call(
        kernel,
        out_shape=jax.ShapeDtypeStruct((8, num_tiles * 128), jnp.float32),
        grid_spec=pltpu.PrefetchScalarGridSpec(
            num_scalar_prefetch=0,
            grid=(num_tiles,),
            in_specs=[
                pl.BlockSpec((tile_rows, wdim), lambda i: (i, 0)),   # confidence f
                pl.BlockSpec((tile_rows, wdim), lambda i: (i, 0)),   # int8 match mask
            ],
            out_specs=pl.BlockSpec((8, 128), lambda i: (0, i)),
        ),
        compiler_params=pltpu.CompilerParams(
            dimension_semantics=("parallel",),
            vmem_limit_bytes=vmem_limit),
    )(f2d, match2d)

    return jnp.sum(partials)


class Confidence_Loss:
    """JAX/Pallas port of lib/core/criterion.py::Confidence_Loss (forward)."""

    def __init__(self, device=None, ignore_label=-1):
        self.ignore_label = ignore_label
        self.device = device  # unused in JAX

    def calculate_H_seed(self, target, x, y):
        # target: (B, H, W) int32; x/y: (B, H, W) float coordinates
        b, h, w = target.shape
        xi = jnp.clip(jnp.floor(x).astype(jnp.int32), 0, w - 1)
        yi = jnp.clip(jnp.floor(y).astype(jnp.int32), 0, h - 1)
        flat = (yi * w + xi).reshape(b, h * w)
        # TODO(synk): data-dependent 2-D gather has no clean Pallas TPU equivalent; done in XLA.
        return jnp.take_along_axis(target.reshape(b, h * w), flat,
                                   axis=1).reshape(b, h, w)

    def __call__(self, o_f, target, w_f=1, **kwargs):
        b, c, ph, pw = o_f.shape
        h, w = target.shape[1], target.shape[2]

        if ph != h or pw != w:
            # TODO(synk): legacy PyTorch F.upsample(mode='bilinear') implies align_corners=True;
            # jax.image.resize uses half-pixel (align_corners=False) semantics.
            o_f = jax.image.resize(o_f, (b, c, h, w), method="bilinear")

        tmp_target = jnp.where(target == self.ignore_label, 0,
                               target).astype(jnp.int32)

        xm = jnp.arange(w, dtype=o_f.dtype).reshape(1, 1, w)
        ym = jnp.arange(h, dtype=o_f.dtype).reshape(1, h, 1)
        h_seed = self.calculate_H_seed(tmp_target, o_f[:, 0] + xm, o_f[:, 1] + ym)

        # Fuse the label compare here (XLA): the kernel only streams f in its
        # native dtype (no pre-upcast) plus a 1-byte match mask.
        match2d = (tmp_target == h_seed).astype(jnp.int8).reshape(b * h, w)
        f2d = o_f[:, 2].reshape(b * h, w)        # lane-dense view, free reshape

        total = _masked_log_loss_sum(f2d, match2d, eps=1e-7)
        f_loss = total / (h * w) / b
        return w_f * f_loss


def _pure_jax_reference(o_f, target, ignore_label=-1, w_f=1, eps=1e-7):
    b, c, ph, pw = o_f.shape
    h, w = target.shape[1], target.shape[2]
    if ph != h or pw != w:
        o_f = jax.image.resize(o_f, (b, c, h, w), method="bilinear")
    tmp = jnp.where(target == ignore_label, 0, target).astype(jnp.int32)
    xm = jnp.arange(w, dtype=o_f.dtype).reshape(1, 1, w)
    ym = jnp.arange(h, dtype=o_f.dtype).reshape(1, h, 1)
    xi = jnp.clip(jnp.floor(o_f[:, 0] + xm).astype(jnp.int32), 0, w - 1)
    yi = jnp.clip(jnp.floor(o_f[:, 1] + ym).astype(jnp.int32), 0, h - 1)
    hs = jnp.take_along_axis(tmp.reshape(b, -1), (yi * w + xi).reshape(b, -1),
                             axis=1).reshape(b, h, w)
    f = o_f[:, 2].astype(jnp.float32)
    match = tmp == hs
    per = jnp.where(match, -jnp.log(f + eps), -jnp.log(1.0 - f + eps))
    return w_f * jnp.sum(per) / (h * w) / b


if __name__ == "__main__":
    key = jax.random.PRNGKey(0)
    k_off, k_conf, k_tgt = jax.random.split(key, 3)

    N, C, H, W = 2, 3, 16, 16
    # o_f at half resolution to exercise the bilinear-upsample path.
    # channels 0/1: spatial offsets; channel 2: confidence in (0, 1).
    off = 2.0 * jax.random.normal(k_off, (N, 2, H // 2, W // 2), dtype=jnp.float32)
    conf = jax.nn.sigmoid(jax.random.normal(k_conf, (N, 1, H // 2, W // 2),
                                            dtype=jnp.float32))
    o_f = jnp.concatenate([off, conf], axis=1)
    # labels in [-1, 5): -1 pixels are remapped to 0 (ignore_label handling)
    target = jax.random.randint(k_tgt, (N, H, W), minval=-1, maxval=5,
                                dtype=jnp.int32)

    criterion = Confidence_Loss(device=None, ignore_label=-1)
    loss = criterion(o_f, target)
    loss = jax.block_until_ready(loss)

    ref = _pure_jax_reference(o_f, target, ignore_label=-1)
    ref = jax.block_until_ready(ref)
    assert jnp.isfinite(loss), loss
    assert jnp.allclose(loss, ref, rtol=1e-5, atol=1e-5), (loss, ref)

    print("KERNEL_OK")
</pallas_src>

<mosaic_0001>
module attributes {stable_mosaic.version = 11 : i64} {
  func.func @_conf_loss_kernel(%arg0: i32, %arg1: memref<32x16xf32, #tpu.memory_space<vmem>>, %arg2: memref<32x16xi8, #tpu.memory_space<vmem>>, %arg3: memref<8x128xf32, #tpu.memory_space<vmem>>) attributes {dimension_semantics = [#tpu.dimension_semantics<parallel>], iteration_bounds = array<i64: 1>, scalar_prefetch = 0 : i64, scratch_operands = 0 : i64, tpu.core_type = #tpu.core_type<tc>, window_params = [{transform_indices = @transform_0, window_bounds = array<i64: 32, 16>}, {transform_indices = @transform_1, window_bounds = array<i64: 32, 16>}, {transform_indices = @transform_2, window_bounds = array<i64: 8, 128>}]} {
    %c0 = arith.constant 0 : index
    %c0_0 = arith.constant 0 : index
    %0 = vector.load %arg1[%c0, %c0_0] : memref<32x16xf32, #tpu.memory_space<vmem>>, vector<32x16xf32>
    %c0_1 = arith.constant 0 : index
    %c0_2 = arith.constant 0 : index
    %1 = vector.load %arg2[%c0_1, %c0_2] : memref<32x16xi8, #tpu.memory_space<vmem>>, vector<32x16xi8>
    %c0_i8 = arith.constant 0 : i8
    %2 = vector.broadcast %c0_i8 : i8 to vector<32x16xi8>
    %3 = arith.cmpi ne, %1, %2 : vector<32x16xi8>
    %cst = arith.constant 1.000000e-07 : f32
    %4 = vector.broadcast %cst : f32 to vector<32x16xf32>
    %5 = arith.addf %0, %4 : vector<32x16xf32>
    %cst_3 = arith.constant 1.000000e+00 : f32
    %6 = vector.broadcast %cst_3 : f32 to vector<32x16xf32>
    %7 = arith.subf %6, %0 : vector<32x16xf32>
    %cst_4 = arith.constant 1.000000e-07 : f32
    %8 = vector.broadcast %cst_4 : f32 to vector<32x16xf32>
    %9 = arith.addf %7, %8 : vector<32x16xf32>
    %10 = arith.select %3, %5, %9 : vector<32x16xi1>, vector<32x16xf32>
    %11 = math.log %10 : vector<32x16xf32>
    %cst_5 = arith.constant 0.000000e+00 : f32
    %12 = vector.broadcast %cst_5 : f32 to vector<32x16xf32>
    %13 = arith.subf %12, %11 : vector<32x16xf32>
    %14 = vector.shape_cast %13 : vector<32x16xf32> to vector<1x32x16xf32>
    %cst_6 = arith.constant dense<0.000000e+00> : vector<1xf32>
    %15 = vector.multi_reduction <add>, %14, %cst_6 [1, 2] : vector<1x32x16xf32> to vector<1xf32>
    %16 = vector.shape_cast %15 : vector<1xf32> to vector<1x1x1xf32>
    %17 = vector.extract %16[0, 0, 0] : f32 from vector<1x1x1xf32>
    %18 = tpu.iota {dimensions = array<i32: 0>} : vector<8x128xi32>
    %19 = tpu.iota {dimensions = array<i32: 1>} : vector<8x128xi32>
    %c0_i32 = arith.constant 0 : i32
    %20 = vector.broadcast %c0_i32 : i32 to vector<8x128xi32>
    %21 = arith.cmpi eq, %18, %20 : vector<8x128xi32>
    %c0_i32_7 = arith.constant 0 : i32
    %22 = vector.broadcast %c0_i32_7 : i32 to vector<8x128xi32>
    %23 = arith.cmpi eq, %19, %22 : vector<8x128xi32>
    %24 = arith.andi %21, %23 : vector<8x128xi1>
    %cst_8 = arith.constant 0.000000e+00 : f32
    %25 = vector.broadcast %17 : f32 to vector<8x128xf32>
    %26 = vector.broadcast %cst_8 : f32 to vector<8x128xf32>
    %27 = arith.select %24, %25, %26 : vector<8x128xi1>, vector<8x128xf32>
    %c0_9 = arith.constant 0 : index
    %c0_10 = arith.constant 0 : index
    %28 = vector.load %arg3[%c0_9, %c0_10] : memref<8x128xf32, #tpu.memory_space<vmem>>, vector<8x128xf32>
    tpu.vector_store %arg3[%c0_9, %c0_10], %27 {strides = array<i32>} : memref<8x128xf32, #tpu.memory_space<vmem>>, vector<8x128xf32>,
    return
  }
  func.func @transform_0(%arg0: i32) -> (i32, i32) {
    %c0_i32 = arith.constant 0 : i32
    %c0_i32_0 = arith.constant 0 : i32
    return %arg0, %c0_i32 : i32, i32
  }
  func.func @transform_1(%arg0: i32) -> (i32, i32) {
    %c0_i32 = arith.constant 0 : i32
    %c0_i32_0 = arith.constant 0 : i32
    return %arg0, %c0_i32 : i32, i32
  }
  func.func @transform_2(%arg0: i32) -> (i32, i32) {
    %c0_i32 = arith.constant 0 : i32
    %c0_i32_0 = arith.constant 0 : i32
    return %c0_i32, %arg0 : i32, i32
  }
}

</mosaic_0001>

<bundles_post_ra>
// kernel: tpu_custom_call.1
= control target key start
LH: loop header
LB: loop body
LE: loop exit
PB: predicated region body
PF: predicated region fallthrough
CT: control target
= control target key end

     0   :  { %v154_v5 = vmov 0   ;;  %s198_s0 = inlined_call_operand.vmem [shape: f32[32,16], index: 0, kind: input, shape index: {}]   ;;  %s199_s1 = inlined_call_operand.vmem [shape: s8[32,16], index: 1, kind: input, shape index: {}]   ;;  %s200_s2 = inlined_call_operand.hbm [shape: f32[8,128], index: 2, kind: output, shape index: {}]  }
   0x1   :  { %v18_v0 = vld [vmem:[%s199_s1] sm:$0xff]  ;;  %v15_v2 = vld [vmem:[%s198_s0 + $0x8] sm:$0xff]  ;;  %v16_v3 = vld [vmem:[%s198_s0 + $0x10] sm:$0xff] }
   0x2   :  { %v14_v1 = vld [vmem:[%s198_s0] sm:$0xff]  ;;  %vm19_vm0 = vnez %v18_v0  ;;  %v17_v4 = vld [vmem:[%s198_s0 + $0x18] sm:$0xff] }
   0x3   :  { %v32_v6 = vsel %vm19_vm0, 16843009, %v154_v5 }
   0x4   :  { %v33_v7 = vunpack.c.0.s8 %v32_v6  ;;  %v34_v8 = vunpack.c.1.s8 %v32_v6  ;;  %v35_v9 = vunpack.c.2.s8 %v32_v6 }
   0x5   :  { %7 = vsyncpa [#allocation3], 0  ;;  %v24_v10 = vsub.f32 1.0, %v14_v1  ;;  %v25_v11 = vsub.f32 1.0, %v15_v2  ;;  %v26_v12 = vsub.f32 1.0, %v16_v3  ;;  %v36_v13 = vunpack.c.3.s8 %v32_v6  ;;  %s155_s0 = smov [#allocation2]  }
   0x6   :  { %v27_v14 = vsub.f32 1.0, %v17_v4  ;;  %v37_v15 = vpack.c.b16 %v33_v7, %v33_v7  ;;  %v39_v16 = vpack.c.b16 %v34_v8, %v34_v8  ;;  %v41_v17 = vpack.c.b16 %v35_v9, %v35_v9  ;;  %s110_s1 = sshll.u32 %s155_s0, 4  ;;  %s111_s1 = int_to_ptr.vmem [resolvable:$true] %s110_s1 }
   0x7   :  { %v20_v18 = vadd.f32 1e-07, %v14_v1  ;;  %v21_v19 = vadd.f32 1e-07, %v15_v2  ;;  %v22_v20 = vadd.f32 1e-07, %v16_v3  ;;  %v43_v21 = vpack.c.b16 %v36_v13, %v36_v13  ;;  %p135_p1 = scmp.lt.s32.totalorder %s111_s1, %s111_s1 }
   0x8   :  { %v23_v22 = vadd.f32 1e-07, %v17_v4  ;;  %v38_v23 = vpack.c.b8 %v37_v15, %v37_v15  ;;  %v40_v24 = vpack.c.b8 %v39_v16, %v39_v16  ;;  %v42_v25 = vpack.c.b8 %v41_v17, %v41_v17  ;;  %s130_s20 = scalar_lea.vmem %s111_s1, 128 }
   0x9   :  { %v28_v26 = vadd.f32 1e-07, %v24_v10  ;;  %v29_v27 = vadd.f32 1e-07, %v25_v11  ;;  %v30_v28 = vadd.f32 1e-07, %v26_v12  ;;  %v44_v29 = vpack.c.b8 %v43_v21, %v43_v21  ;;  %p131_p0 = scmp.ne.s32.totalorder %s111_s1, %s130_s20  ;;  %p136_p2 = scmp.lt.s32.totalorder %s130_s20, %s130_s20 }
   0xa   :  { %v31_v30 = vadd.f32 1e-07, %v27_v14  ;;  %vm45_vm1 = vnez %v38_v23  ;;  %vm46_vm2 = vnez %v40_v24  ;;  %vm47_vm3 = vnez %v42_v25 }
   0xb   :  { %vm48_vm4 = vnez %v44_v29  ;;  %v49_v31 = vsel %vm45_vm1, 16843009, %v154_v5  ;;  %v50_v32 = vsel %vm46_vm2, 16843009, %v154_v5  ;;  %v51_v33 = vsel %vm47_vm3, 16843009, %v154_v5  ;;  %p137_p3 = por %p136_p2, %p135_p1 }
   0xc   :  { %v52_v34 = vsel %vm48_vm4, 16843009, %v154_v5  ;;  %v53_v35 = vunpack.c.0.s8 %v49_v31  ;;  %v54_v36 = vunpack.c.0.s8 %v50_v32  ;;  %v55_v37 = vunpack.c.0.s8 %v51_v33 }
   0xd   :  { %v56_v38 = vunpack.c.0.s8 %v52_v34  ;;  %vm77_vm9 = vcmask 130048   ;;  %v94_v5 = vlaneseq  ;;  %p138_p4 = pnand %p137_p3, %p131_p0 }
   0xe   :  { %vm57_vm5 = vcmp.ne.s32.totalorder %v53_v35, 0  ;;  %vm58_vm6 = vcmp.ne.s32.totalorder %v54_v36, 0  ;;  %vm59_vm7 = vcmp.ne.s32.totalorder %v55_v37, 0 }
   0xf   :  { %vm60_vm8 = vcmp.ne.s32.totalorder %v56_v38, 0  ;;  %v61_v39 = vsel %vm57_vm5, %v20_v18, %v28_v26  ;;  %v62_v40 = vsel %vm58_vm6, %v21_v19, %v29_v27  ;;  %v63_v41 = vsel %vm59_vm7, %v22_v20, %v30_v28 }
  0x10   :  { %v64_v42 = vsel %vm60_vm8, %v23_v22, %v31_v30  ;;  %122 = vlog2.f32 %v61_v39  ;;  %v95_v6 = vshrl.u32 %v94_v5, 7  ;;  %v97_v7 = vand.u32 127, %v94_v5 }
  0x11   :  { %124 = vlog2.f32 %v62_v40 }
  0x12   :  { %126 = vlog2.f32 %v63_v41  ;;  %vm98_vm10 = vcmp.eq.s32.totalorder %v95_v6, 0  ;;  %vm99_vm11 = vcmp.eq.s32.totalorder %v97_v7, 0 }
  0x13   :  { %128 = vlog2.f32 %v64_v42  ;;  %vm100_vm12 = vmand %vm98_vm10, %vm99_vm11 }
  0x1a   :  { %v123_v43 = vpop.eup %122 }
  0x1b   :  { %v125_v44 = vpop.eup %124  ;;  %v66_v45 = vmul.f32 0.6931472, %v123_v43 }
  0x1c   :  { %v127_v46 = vpop.eup %126  ;;  %v68_v47 = vmul.f32 0.6931472, %v125_v44 }
  0x1d   :  { %v129_v48 = vpop.eup %128  ;;  %v70_v49 = vmul.f32 0.6931472, %v127_v46  ;;  %v73_v50 = vsub.f32 0.0, %v66_v45 }
  0x1e   :  { %v72_v51 = vmul.f32 0.6931472, %v129_v48  ;;  %v74_v52 = vsub.f32 0.0, %v68_v47 }
  0x1f   :  { %v75_v53 = vsub.f32 0.0, %v70_v49  ;;  %v78_v54 = vsel %vm77_vm9, %v73_v50, 0.0 }
  0x20   :  { %v76_v55 = vsub.f32 0.0, %v72_v51  ;;  %v79_v56 = vsel %vm77_vm9, %v74_v52, 0.0 }
  0x21   :  { %v80_v57 = vadd.f32 %v79_v56, %v78_v54  ;;  %v81_v58 = vsel %vm77_vm9, %v75_v53, 0.0 }
  0x22   :  { %v83_v59 = vsel %vm77_vm9, %v76_v55, 0.0 }
  0x23   :  { %v82_v60 = vadd.f32 %v81_v58, %v80_v57 }
  0x25   :  { %v84_v61 = vadd.f32 %v83_v59, %v82_v60 }
  0x27   :  { %85 = vadd.xlane.f32.xlu0 %v84_v61 }
  0xb4   :  { %v86_v62 = vpop.xlane.xlu0 %85 }
  0xb5   :  { %v87_v63 = vrot.slane %v86_v62, 4 }
  0xb7   :  { %v88_v0 = vadd.f32 %v87_v63, %v86_v62 }
  0xb9   :  { %v89_v1 = vrot.slane %v88_v0, 2 }
  0xbb   :  { %v90_v2 = vadd.f32 %v89_v1, %v88_v0 }
  0xbd   :  { %v91_v3 = vrot.slane %v90_v2, 1 }
  0xbf   :  { %v92_v4 = vadd.f32 %v91_v3, %v90_v2 }
  0xc1   :  { %118 = vpush %v92_v4 }
  0xf2   :  { %s119_s19 = spop %118 }
  0xf3   :  { %v101_v8 = vstv %s119_s19 }
  0xf4   :  { %v102_v9 = vsel %vm100_vm12, %v101_v8, 0.0 }
  0xf5   :  { %103 = vst [vmem:[#allocation2] sm:$0xff] %v102_v9 }
  0xf6   :  { %141 = shalt.err (!%p138_p4)
}
  0xf7   :  { %s142_s23 = scalar_lea.hbm %s200_s2, 128 }
  0xf8   :  { %p143_p5 = scmp.ne.s32.totalorder %s200_s2, %s142_s23  ;;  %p146_p6 = scmp.lt.u32.totalorder %s142_s23, %s200_s2 }
  0xfa   :  { %p148_p7 = pnand %p146_p6, %p143_p5 }
  0xfc   :  { %151 = shalt.err (!%p148_p7)
}
  0xfd   :  { %113 = dma.vmem_to_hbm [thread:$0]  %s111_s1, 128, %s200_s2, [#allocation3]  }
  0xfe   :  { %152 = dma.done.wait [#allocation3], 128  }
  0xff   :  { %153 = vsyncadd [#allocation3], 4294967168 }
 0x100   :  { %117 = vsyncpa [#allocation3], 1 }

</bundles_post_ra>
